<compile_context>
chip_gen: v7x
topology: tpu7x:2x2x1
jax: 0.10.0
libtpu: 0.0.40
codegen_flags: <defaults>
</compile_context>

<pallas_src>
import math

import jax
import jax.numpy as jnp
from jax import lax
from jax.experimental import pallas as pl
from jax.experimental.pallas import tpu as pltpu


def _round_up(x, m):
    return (x + m - 1) // m * m


def _vmem_capacity_bytes():
    """Trace-time VMEM capacity of the local chip, conservative fallback."""
    try:
        info = pltpu.get_tpu_info()
        cap = getattr(info, "vmem_capacity_bytes", None)
        if cap:
            return int(cap)
    except Exception:
        pass
    return 64 << 20  # conservative (v7x per-TensorCore)


def _weight_spec(shape, index_map, buffers):
    """BlockSpec with N-deep pipelining; falls back if kwarg unsupported."""
    try:
        return pl.BlockSpec(shape, index_map, pipeline_mode=pl.Buffered(buffers))
    except TypeError:
        return pl.BlockSpec(shape, index_map)


# --------------------------------------------------------------------------
# Kernels
# --------------------------------------------------------------------------
def _mlp_resident_kernel(x_ref, w1_ref, b1_ref, w2_ref, b2_ref, o_ref):
    # Weights fully resident in VMEM -> single fused pass, no accumulator.
    # x_ref : (tm, C_pad) bf16      w1_ref: (C_pad, H_pad) bf16
    # b1_ref: (1, H_pad)  f32       w2_ref: (H_pad, C_pad) bf16
    # b2_ref: (1, C_pad)  f32       o_ref : (tm, C_pad)    out dtype
    h = jnp.dot(x_ref[...], w1_ref[...], preferred_element_type=jnp.float32)
    h = h + b1_ref[...]
    # Exact GELU (erf form) -> matches torch.nn.GELU() default.
    h = 0.5 * h * (1.0 + lax.erf(h * (1.0 / math.sqrt(2.0))))
    # Dropout(p=0.0) is identity.
    o = jnp.dot(h.astype(w2_ref.dtype), w2_ref[...],
                preferred_element_type=jnp.float32)
    o_ref[...] = (o + b2_ref[...]).astype(o_ref.dtype)


def _mlp_stream_kernel(x_ref, w1_ref, b1_ref, w2_ref, b2_ref, o_ref, acc_ref):
    # Fallback: hidden dim streamed in (C_pad, th)/(th, C_pad) blocks with an
    # f32 VMEM accumulator over the innermost ("arbitrary") grid axis.
    k = pl.program_id(1)

    @pl.when(k == 0)
    def _():
        acc_ref[...] = jnp.zeros_like(acc_ref)

    h = jnp.dot(x_ref[...], w1_ref[...], preferred_element_type=jnp.float32)
    h = h + b1_ref[...]
    h = 0.5 * h * (1.0 + lax.erf(h * (1.0 / math.sqrt(2.0))))
    acc_ref[...] += jnp.dot(h.astype(w2_ref.dtype), w2_ref[...],
                            preferred_element_type=jnp.float32)

    @pl.when(k == pl.num_programs(1) - 1)
    def _():
        # b2 added exactly once, on the last reduction step.
        o_ref[...] = (acc_ref[...] + b2_ref[...]).astype(o_ref.dtype)


# --------------------------------------------------------------------------
# Wrapper
# --------------------------------------------------------------------------
def mlp_pallas(x, w1, b1, w2, b2, *, token_tile=256, hidden_tile=512,
               compute_dtype=jnp.bfloat16, out_dtype=None,
               force_streaming=False):
    """x: (B, N, C).  w1: (C, H), b1: (H,), w2: (H, C), b2: (C,)."""
    B, N, C = x.shape
    Cw, H = w1.shape
    assert Cw == C and w2.shape == (H, C) and b1.shape == (H,) and b2.shape == (C,)
    out_dtype = out_dtype or x.dtype
    T = B * N

    # Lane-dense feature padding.
    C_pad = _round_up(C, 128)
    H_pad = _round_up(H, 128)

    cbytes = jnp.dtype(compute_dtype).itemsize
    obytes = jnp.dtype(out_dtype).itemsize

    # Generation-aware VMEM budget (v7x: ~48 MiB, v5e/v6e: ~96 MiB).
    vmem_budget = int(0.75 * _vmem_capacity_bytes())

    # Token tile clamped to the problem (tiny calls don't pad 16x) and to the
    # bf16 sublane packing (multiple of 16).
    tm = _round_up(max(16, min(token_tile, T)), 16)
    T_pad = _round_up(T, tm)

    def resident_vmem(tm_):
        return (2 * tm_ * C_pad * cbytes          # x tile (double buffered)
                + 2 * tm_ * C_pad * obytes        # out tile
                + 2 * C_pad * H_pad * cbytes      # w1 (budget 2x even if fetched once)
                + 2 * H_pad * C_pad * cbytes      # w2
                + 2 * (H_pad + C_pad) * 4         # biases
                + tm_ * H_pad * (4 + cbytes))     # h intermediate (f32 + bf16 copy)

    resident = (not force_streaming) and \
               (resident_vmem(tm) + (4 << 20) <= vmem_budget)

    if not resident:
        # Streaming path: raise tm for arithmetic intensity against streamed
        # weights, then pick a hidden tile that divides H_pad and fits VMEM.
        tm = _round_up(max(16, min(max(token_tile, 512), T)), 16)
        T_pad = _round_up(T, tm)

        def streaming_vmem(tm_, th_):
            return (2 * tm_ * C_pad * cbytes
                    + 2 * tm_ * C_pad * obytes
                    + 3 * C_pad * th_ * cbytes    # w1 block (3-deep)
                    + 3 * th_ * C_pad * cbytes    # w2 block (3-deep)
                    + 2 * (th_ + C_pad) * 4
                    + tm_ * C_pad * 4             # f32 accumulator scratch
                    + tm_ * th_ * (4 + cbytes))   # h intermediate

        th = min(_round_up(hidden_tile, 128), H_pad)
        while th > 128 and (H_pad % th or
                            streaming_vmem(tm, th) + (4 << 20) > vmem_budget):
            th -= 128
        th = max(th, 128)

    # Pad (zeros) and cast.  Zero-padded hidden columns give GELU(bias=0)=0
    # only if their b1 entries are 0 (they are, we pad with zeros), so they
    # contribute nothing; zero-padded output columns are sliced off below.
    x2d = jnp.pad(x.reshape(T, C),
                  ((0, T_pad - T), (0, C_pad - C))).astype(compute_dtype)
    w1p = jnp.pad(w1, ((0, C_pad - C), (0, H_pad - H))).astype(compute_dtype)
    w2p = jnp.pad(w2, ((0, H_pad - H), (0, C_pad - C))).astype(compute_dtype)
    b1p = jnp.pad(b1, (0, H_pad - H)).astype(jnp.float32).reshape(1, H_pad)
    b2p = jnp.pad(b2, (0, C_pad - C)).astype(jnp.float32).reshape(1, C_pad)

    flops = 4 * T_pad * C_pad * H_pad            # two matmuls, 2 flops/MAC
    weight_bytes = 2 * C_pad * H_pad * cbytes    # w1 + w2

    if resident:
        grid = (T_pad // tm,)
        kernel = _mlp_resident_kernel
        in_specs = [
            pl.BlockSpec((tm, C_pad),    lambda i: (i, 0)),   # x tile
            pl.BlockSpec((C_pad, H_pad), lambda i: (0, 0)),   # w1 (resident)
            pl.BlockSpec((1, H_pad),     lambda i: (0, 0)),   # b1
            pl.BlockSpec((H_pad, C_pad), lambda i: (0, 0)),   # w2 (resident)
            pl.BlockSpec((1, C_pad),     lambda i: (0, 0)),   # b2
        ]
        out_specs = pl.BlockSpec((tm, C_pad), lambda i: (i, 0))
        scratch_shapes = []
        dim_sem = ("parallel",)
        vmem_needed = resident_vmem(tm)
        bytes_accessed = (T_pad * C_pad * (cbytes + obytes)
                          + weight_bytes + (H_pad + C_pad) * 4)
    else:
        grid = (T_pad // tm, H_pad // th)
        kernel = _mlp_stream_kernel
        in_specs = [
            pl.BlockSpec((tm, C_pad), lambda i, k: (i, 0)),           # x tile
            _weight_spec((C_pad, th), lambda i, k: (0, k), 3),        # w1 slice
            pl.BlockSpec((1, th),     lambda i, k: (0, k)),           # b1 slice
            _weight_spec((th, C_pad), lambda i, k: (k, 0), 3),        # w2 slice
            pl.BlockSpec((1, C_pad),  lambda i, k: (0, 0)),           # b2
        ]
        out_specs = pl.BlockSpec((tm, C_pad), lambda i, k: (i, 0))
        scratch_shapes = [pltpu.VMEM((tm, C_pad), jnp.float32)]
        dim_sem = ("parallel", "arbitrary")
        vmem_needed = streaming_vmem(tm, th)
        bytes_accessed = (T_pad * C_pad * (cbytes + obytes)
                          + grid[0] * weight_bytes + (H_pad + C_pad) * 4)

    vmem_limit = min(max(int(1.25 * vmem_needed) + (4 << 20), 32 << 20),
                     vmem_budget)

    out2d = pl.pallas_call(
        kernel,
        out_shape=jax.ShapeDtypeStruct((T_pad, C_pad), out_dtype),
        grid_spec=pltpu.PrefetchScalarGridSpec(
            num_scalar_prefetch=0,
            grid=grid,
            in_specs=in_specs,
            out_specs=out_specs,
            scratch_shapes=scratch_shapes,
        ),
        compiler_params=pltpu.CompilerParams(
            dimension_semantics=dim_sem,
            vmem_limit_bytes=vmem_limit,
        ),
        cost_estimate=pl.CostEstimate(
            flops=flops,
            transcendentals=T_pad * H_pad,
            bytes_accessed=bytes_accessed,
        ),
    )(x2d, w1p, b1p, w2p, b2p)

    return out2d[:T, :C].reshape(B, N, C)


# --------------------------------------------------------------------------
# Params / reference
# --------------------------------------------------------------------------
def init_mlp_params(key, in_features, hidden_features, dtype=jnp.float32):
    """Deterministic init mimicking nn.Linear defaults (kaiming-uniform-ish)."""
    k1, k2, k3, k4 = jax.random.split(key, 4)
    bound1 = 1.0 / math.sqrt(in_features)
    bound2 = 1.0 / math.sqrt(hidden_features)
    # Stored pre-transposed relative to PyTorch: w1 is (C, H) so y = x @ w1 + b1.
    w1 = jax.random.uniform(k1, (in_features, hidden_features), dtype, -bound1, bound1)
    b1 = jax.random.uniform(k2, (hidden_features,), dtype, -bound1, bound1)
    w2 = jax.random.uniform(k3, (hidden_features, in_features), dtype, -bound2, bound2)
    b2 = jax.random.uniform(k4, (in_features,), dtype, -bound2, bound2)
    return w1, b1, w2, b2


def mlp_reference(x, w1, b1, w2, b2, compute_dtype=jnp.bfloat16):
    """Pure-JAX reference using the same bf16-weights / f32-accumulation recipe."""
    B, N, C = x.shape
    xb = x.reshape(B * N, C).astype(compute_dtype)
    h = jnp.dot(xb, w1.astype(compute_dtype), preferred_element_type=jnp.float32)
    h = h + b1.astype(jnp.float32)[None, :]
    h = 0.5 * h * (1.0 + lax.erf(h * (1.0 / math.sqrt(2.0))))
    o = jnp.dot(h.astype(compute_dtype), w2.astype(compute_dtype),
                preferred_element_type=jnp.float32)
    o = o + b2.astype(jnp.float32)[None, :]
    return o.astype(x.dtype).reshape(B, N, C)


if __name__ == "__main__":
    key = jax.random.PRNGKey(0)
    kx1, kp1, kx2, kp2 = jax.random.split(key, 4)

    # --- 1. Small shapes consistent with the module (resident-weight path) ---
    B, N, C, Hid = 2, 8, 32, 64
    x = jax.random.normal(kx1, (B, N, C), jnp.float32)
    w1, b1, w2, b2 = init_mlp_params(kp1, C, Hid)

    out = jax.block_until_ready(mlp_pallas(x, w1, b1, w2, b2))
    ref = mlp_reference(x, w1, b1, w2, b2)
    assert out.shape == x.shape
    assert jnp.allclose(out, ref, atol=5e-3, rtol=5e-3), "mismatch (resident path)"

    # --- 2. Exercise the streaming (k-reduction) fallback path as well ---
    B2, N2, C2, Hid2 = 2, 128, 96, 384
    x2 = jax.random.normal(kx2, (B2, N2, C2), jnp.float32)
    w1b, b1b, w2b, b2b = init_mlp_params(kp2, C2, Hid2)

    out2 = jax.block_until_ready(
        mlp_pallas(x2, w1b, b1b, w2b, b2b, hidden_tile=128, force_streaming=True))
    ref2 = mlp_reference(x2, w1b, b1b, w2b, b2b)
    assert out2.shape == x2.shape
    assert jnp.allclose(out2, ref2, atol=5e-3, rtol=5e-3), "mismatch (streaming path)"

    print("KERNEL_OK")
</pallas_src>

<mosaic_0001>
module attributes {stable_mosaic.version = 11 : i64} {
  func.func @_mlp_resident_kernel(%arg0: i32, %arg1: memref<16x128xbf16, #tpu.memory_space<vmem>>, %arg2: memref<128x128xbf16, #tpu.memory_space<vmem>>, %arg3: memref<1x128xf32, #tpu.memory_space<vmem>>, %arg4: memref<128x128xbf16, #tpu.memory_space<vmem>>, %arg5: memref<1x128xf32, #tpu.memory_space<vmem>>, %arg6: memref<16x128xf32, #tpu.memory_space<vmem>>) attributes {dimension_semantics = [#tpu.dimension_semantics<parallel>], iteration_bounds = array<i64: 1>, scalar_prefetch = 0 : i64, scratch_operands = 0 : i64, tpu.core_type = #tpu.core_type<tc>, window_params = [{transform_indices = @transform_0, window_bounds = array<i64: 16, 128>}, {pipeline_mode = #tpu.pipeline_mode<synchronous>, transform_indices = @transform_1, window_bounds = array<i64: 128, 128>}, {pipeline_mode = #tpu.pipeline_mode<synchronous>, transform_indices = @transform_2, window_bounds = array<i64: 1, 128>}, {pipeline_mode = #tpu.pipeline_mode<synchronous>, transform_indices = @transform_3, window_bounds = array<i64: 128, 128>}, {pipeline_mode = #tpu.pipeline_mode<synchronous>, transform_indices = @transform_4, window_bounds = array<i64: 1, 128>}, {transform_indices = @transform_5, window_bounds = array<i64: 16, 128>}]} {
    %c0 = arith.constant 0 : index
    %c0_0 = arith.constant 0 : index
    %0 = vector.load %arg1[%c0, %c0_0] : memref<16x128xbf16, #tpu.memory_space<vmem>>, vector<16x128xbf16>
    %c0_1 = arith.constant 0 : index
    %c0_2 = arith.constant 0 : index
    %1 = vector.load %arg2[%c0_1, %c0_2] : memref<128x128xbf16, #tpu.memory_space<vmem>>, vector<128x128xbf16>
    %cst = arith.constant dense<0.000000e+00> : vector<16x128xf32>
    %2 = tpu.matmul %0, %1, %cst {dimension_numbers = #tpu.dot_dimension_numbers<[1], [0], [0], [1], [0, 0, 1, 1], [], []>} : vector<16x128xbf16>, vector<128x128xbf16>, vector<16x128xf32> -> vector<16x128xf32>
    %c0_3 = arith.constant 0 : index
    %c0_4 = arith.constant 0 : index
    %3 = vector.load %arg3[%c0_3, %c0_4] : memref<1x128xf32, #tpu.memory_space<vmem>>, vector<1x128xf32>
    %4 = vector.broadcast %3 : vector<1x128xf32> to vector<16x128xf32>
    %5 = arith.addf %2, %4 : vector<16x128xf32>
    %cst_5 = arith.constant 5.000000e-01 : f32
    %6 = vector.broadcast %cst_5 : f32 to vector<16x128xf32>
    %7 = arith.mulf %6, %5 : vector<16x128xf32>
    %cst_6 = arith.constant 0.707106769 : f32
    %8 = vector.broadcast %cst_6 : f32 to vector<16x128xf32>
    %9 = arith.mulf %5, %8 : vector<16x128xf32>
    %10 = math.erf %9 : vector<16x128xf32>
    %cst_7 = arith.constant 1.000000e+00 : f32
    %11 = vector.broadcast %cst_7 : f32 to vector<16x128xf32>
    %12 = arith.addf %11, %10 : vector<16x128xf32>
    %13 = arith.mulf %7, %12 : vector<16x128xf32>
    %14 = arith.truncf %13 : vector<16x128xf32> to vector<16x128xbf16>
    %c0_8 = arith.constant 0 : index
    %c0_9 = arith.constant 0 : index
    %15 = vector.load %arg4[%c0_8, %c0_9] : memref<128x128xbf16, #tpu.memory_space<vmem>>, vector<128x128xbf16>
    %cst_10 = arith.constant dense<0.000000e+00> : vector<16x128xf32>
    %16 = tpu.matmul %14, %15, %cst_10 {dimension_numbers = #tpu.dot_dimension_numbers<[1], [0], [0], [1], [0, 0, 1, 1], [], []>} : vector<16x128xbf16>, vector<128x128xbf16>, vector<16x128xf32> -> vector<16x128xf32>
    %c0_11 = arith.constant 0 : index
    %c0_12 = arith.constant 0 : index
    %17 = vector.load %arg5[%c0_11, %c0_12] : memref<1x128xf32, #tpu.memory_space<vmem>>, vector<1x128xf32>
    %18 = vector.broadcast %17 : vector<1x128xf32> to vector<16x128xf32>
    %19 = arith.addf %16, %18 : vector<16x128xf32>
    %c0_13 = arith.constant 0 : index
    %c0_14 = arith.constant 0 : index
    %20 = vector.load %arg6[%c0_13, %c0_14] : memref<16x128xf32, #tpu.memory_space<vmem>>, vector<16x128xf32>
    tpu.vector_store %arg6[%c0_13, %c0_14], %19 {strides = array<i32>} : memref<16x128xf32, #tpu.memory_space<vmem>>, vector<16x128xf32>,
    return
  }
  func.func @transform_0(%arg0: i32) -> (i32, i32) {
    %c0_i32 = arith.constant 0 : i32
    %c0_i32_0 = arith.constant 0 : i32
    return %arg0, %c0_i32 : i32, i32
  }
  func.func @transform_1(%arg0: i32) -> (i32, i32) {
    %c0_i32 = arith.constant 0 : i32
    %c0_i32_0 = arith.constant 0 : i32
    %c0_i32_1 = arith.constant 0 : i32
    return %c0_i32, %c0_i32_0 : i32, i32
  }
  func.func @transform_2(%arg0: i32) -> (i32, i32) {
    %c0_i32 = arith.constant 0 : i32
    %c0_i32_0 = arith.constant 0 : i32
    %c0_i32_1 = arith.constant 0 : i32
    return %c0_i32, %c0_i32_0 : i32, i32
  }
  func.func @transform_3(%arg0: i32) -> (i32, i32) {
    %c0_i32 = arith.constant 0 : i32
    %c0_i32_0 = arith.constant 0 : i32
    %c0_i32_1 = arith.constant 0 : i32
    return %c0_i32, %c0_i32_0 : i32, i32
  }
  func.func @transform_4(%arg0: i32) -> (i32, i32) {
    %c0_i32 = arith.constant 0 : i32
    %c0_i32_0 = arith.constant 0 : i32
    %c0_i32_1 = arith.constant 0 : i32
    return %c0_i32, %c0_i32_0 : i32, i32
  }
  func.func @transform_5(%arg0: i32) -> (i32, i32) {
    %c0_i32 = arith.constant 0 : i32
    %c0_i32_0 = arith.constant 0 : i32
    return %arg0, %c0_i32 : i32, i32
  }
}

</mosaic_0001>

<bundles_post_ra>
// kernel: tpu_custom_call.1
= control target key start
LH: loop header
LB: loop body
LE: loop exit
PB: predicated region body
PF: predicated region fallthrough
CT: control target
= control target key end

     0   :  { %10 = vsyncpa [#allocation3], 0  ;;  %s638_s0 = inlined_call_operand.hbm [shape: bf16[16,128], index: 0, kind: input, shape index: {}]   ;;  %s639_s1 = inlined_call_operand.hbm [shape: bf16[128,128], index: 1, kind: input, shape index: {}]   ;;  %s640_s2 = inlined_call_operand.vmem [shape: f32[1,128], index: 2, kind: input, shape index: {}]   ;;  %s641_s3 = inlined_call_operand.hbm [shape: bf16[128,128], index: 3, kind: input, shape index: {}]   ;;  %s642_s4 = inlined_call_operand.vmem [shape: f32[1,128], index: 4, kind: input, shape index: {}]   ;;  %s643_s5 = inlined_call_operand.hbm [shape: f32[16,128], index: 5, kind: output, shape index: {}]  }
   0x1   :  { %11 = vsyncpa [#allocation6], 0 }
   0x2   :  { %12 = vsyncpa [#allocation4], 0  ;;  %s528_s18 = smov [#allocation5]   ;;  %s529_s20 = smov [#allocation2]  }
   0x3   :  { %s30_s19 = sshll.u32 %s528_s18, 4  ;;  %s18_s21 = sshll.u32 %s529_s20, 4  ;;  %s31_s19 = int_to_ptr.vmem [resolvable:$true] %s30_s19  ;;  %s568_s21 = int_to_ptr.vmem [resolvable:$true] %s18_s21 }
   0x4   :  { %s434_s24 = scalar_lea.hbm %s639_s1, 1024 }
   0x5   :  { %p435_p0 = scmp.ne.s32.totalorder %s639_s1, %s434_s24  ;;  %p438_p1 = scmp.lt.u32.totalorder %s434_s24, %s639_s1 }
   0x7   :  { %p440_p2 = pnand %p438_p1, %p435_p0 }
   0x9   :  { %443 = shalt.err (!%p440_p2)
}
   0xa   :  { %s444_s29 = scalar_lea.vmem %s31_s19, 1024  ;;  %p449_p4 = scmp.lt.s32.totalorder %s31_s19, %s31_s19 }
   0xb   :  { %p445_p3 = scmp.ne.s32.totalorder %s31_s19, %s444_s29  ;;  %p450_p5 = scmp.lt.s32.totalorder %s444_s29, %s444_s29 }
   0xd   :  { %p451_p6 = por %p450_p5, %p449_p4 }
   0xf   :  { %p452_p7 = pnand %p451_p6, %p445_p3 }
  0x11   :  { %455 = shalt.err (!%p452_p7)
}
  0x12   :  { %s530_s30 = smov 64   ;;  %s531_s6 = smov 4  }
  0x13   :  { %36 = dma.hbm_to_vmem [thread:$0]  %s639_s1, 1024, %s31_s19, [#allocation6], %s530_s30, %s530_s30, %s531_s6  }
  0x14   :  { %s456_s11 = scalar_lea.hbm %s638_s0, 128 }
  0x15   :  { %p457_p8 = scmp.ne.s32.totalorder %s638_s0, %s456_s11  ;;  %p460_p9 = scmp.lt.u32.totalorder %s456_s11, %s638_s0 }
  0x17   :  { %p462_p10 = pnand %p460_p9, %p457_p8 }
  0x19   :  { %465 = shalt.err (!%p462_p10)
}
  0x1a   :  { %s466_s16 = scalar_lea.vmem %s568_s21, 128  ;;  %p471_p12 = scmp.lt.s32.totalorder %s568_s21, %s568_s21 }
  0x1b   :  { %p467_p11 = scmp.ne.s32.totalorder %s568_s21, %s466_s16  ;;  %p472_p13 = scmp.lt.s32.totalorder %s466_s16, %s466_s16 }
  0x1d   :  { %p473_p0 = por %p472_p13, %p471_p12 }
  0x1f   :  { %p474_p1 = pnand %p473_p0, %p467_p11 }
  0x21   :  { %477 = shalt.err (!%p474_p1)
}
  0x22   :  { %24 = dma.hbm_to_vmem [thread:$0]  %s638_s0, 128, %s568_s21, [#allocation3], %s530_s30, %s530_s30, %s531_s6  }
  0x23   :  { %s532_s18 = smov [#allocation7]   ;;  %s478_s23 = scalar_lea.hbm %s641_s3, 1024 }
  0x24   :  { %s44_s19 = sshll.u32 %s532_s18, 4  ;;  %p479_p2 = scmp.ne.s32.totalorder %s641_s3, %s478_s23  ;;  %s45_s19 = int_to_ptr.vmem [resolvable:$true] %s44_s19 }
  0x25   :  { %p482_p3 = scmp.lt.u32.totalorder %s478_s23, %s641_s3 }
  0x27   :  { %p484_p4 = pnand %p482_p3, %p479_p2 }
  0x29   :  { %487 = shalt.err (!%p484_p4)
}
  0x2a   :  { %s488_s28 = scalar_lea.vmem %s45_s19, 1024  ;;  %p493_p6 = scmp.lt.s32.totalorder %s45_s19, %s45_s19 }
  0x2b   :  { %p489_p5 = scmp.ne.s32.totalorder %s45_s19, %s488_s28  ;;  %p494_p7 = scmp.lt.s32.totalorder %s488_s28, %s488_s28 }
  0x2d   :  { %p495_p8 = por %p494_p7, %p493_p6 }
  0x2f   :  { %p496_p9 = pnand %p495_p8, %p489_p5 }
  0x31   :  { %499 = shalt.err (!%p496_p9)
}
  0x32   :  { %50 = dma.hbm_to_vmem [thread:$0]  %s641_s3, 1024, %s45_s19, [#allocation6], %s530_s30, %s530_s30, %s531_s6  }
  0x33   :  { %522 = dma.done.wait [#allocation3], 128  }
  0x34   :  { %523 = vsyncadd [#allocation3], 4294967168 }
  0x35   :  { %524 = dma.done.wait [#allocation6], 2048  }
  0x36   :  { %525 = vsyncadd [#allocation6], 4294965248  ;;  %v533_v0 = vmov 0.0   ;;  %vm534_vm0 = vmmov 0   ;;  %v413_v1 = vld [vmem:[#allocation5] sm:$0xff]   ;;  %v414_v2 = vld [vmem:[#allocation5 + $0x8] sm:$0xff]  }
  0x37   :  { %363 = vmatprep.subr.bf16.mxu0 %v533_v0  ;;  %379 = vmatprep.mubr.msk.bf16.mxu0 %vm534_vm0, %v533_v0  ;;  %v415_v3 = vld [vmem:[#allocation5 + $0x10] sm:$0xff]   ;;  %v422_v4 = vld [vmem:[#allocation7] sm:$0xff]   ;;  %v416_v5 = vld [vmem:[#allocation5 + $0x18] sm:$0xff]   ;;  %s535_s6 = smov [#allocation8]  }
  0x38   :  { %383 = vmatprep.subr.bf16.mxu1 %v533_v0  ;;  %399 = vmatprep.mubr.msk.bf16.mxu1 %vm534_vm0, %v533_v0  ;;  %v423_v6 = vld [vmem:[#allocation7 + $0x8] sm:$0xff]   ;;  %v417_v7 = vld [vmem:[#allocation5 + $0x20] sm:$0xff]   ;;  %v419_v9 = vld [vmem:[#allocation5 + $0x30] sm:$0xff]   ;;  %s313_s7 = sshll.u32 %s535_s6, 4  ;;  %s314_s7 = int_to_ptr.vmem [resolvable:$true] %s313_s7 }
  0x39   :  { %364 = vmatpush3.bf16.msra.mxu0 %v413_v1  ;;  %384 = vmatpush3.bf16.msra.mxu1 %v422_v4  ;;  %v418_v8 = vld [vmem:[#allocation5 + $0x28] sm:$0xff]   ;;  %v420_v10 = vld [vmem:[#allocation5 + $0x38] sm:$0xff]   ;;  %v424_v12 = vld [vmem:[#allocation7 + $0x10] sm:$0xff]   ;;  %s500_s8 = scalar_lea.vmem %s314_s7, 256  ;;  %p505_p11 = scmp.lt.s32.totalorder %s314_s7, %s314_s7 }
  0x3a   :  { %365 = vmatprep.subr.bf16.mxu0 %v533_v0  ;;  %385 = vmatprep.subr.bf16.mxu1 %v533_v0  ;;  %v421_v11 = vld [vmem:[#allocation2] sm:$0xff]   ;;  %v426_v14 = vld [vmem:[#allocation7 + $0x20] sm:$0xff]   ;;  %v427_v15 = vld [vmem:[#allocation7 + $0x28] sm:$0xff]   ;;  %p501_p10 = scmp.ne.s32.totalorder %s314_s7, %s500_s8  ;;  %p506_p12 = scmp.lt.s32.totalorder %s500_s8, %s500_s8 }
  0x3b   :  { %v425_v13 = vld [vmem:[#allocation7 + $0x18] sm:$0xff]   ;;  %v428_v16 = vld [vmem:[#allocation7 + $0x30] sm:$0xff]  }
  0x3c   :  { %v429_v17 = vld [vmem:[#allocation7 + $0x38] sm:$0xff]   ;;  %p507_p13 = por %p506_p12, %p505_p11 }
  0x3d   :  { %366 = vmatpush3.bf16.msra.mxu0 %v414_v2  ;;  %386 = vmatpush3.bf16.msra.mxu1 %v423_v6  ;;  %v326_v18 = vld [vmem:[%s640_s2] ss:$0 sm:$0xff] }
  0x3e   :  { %367 = vmatprep.subr.bf16.mxu0 %v533_v0  ;;  %387 = vmatprep.subr.bf16.mxu1 %v533_v0  ;;  %v336_v36 = vld [vmem:[%s642_s4] ss:$0 sm:$0xff]  ;;  %p508_p0 = pnand %p507_p13, %p501_p10 }
  0x41   :  { %368 = vmatpush3.bf16.msra.mxu0 %v415_v3  ;;  %388 = vmatpush3.bf16.msra.mxu1 %v424_v12 }
  0x42   :  { %369 = vmatprep.subr.bf16.mxu0 %v533_v0  ;;  %389 = vmatprep.subr.bf16.mxu1 %v533_v0 }
  0x45   :  { %370 = vmatpush3.bf16.msra.mxu0 %v416_v5  ;;  %390 = vmatpush3.bf16.msra.mxu1 %v425_v13 }
  0x46   :  { %371 = vmatprep.subr.bf16.mxu0 %v533_v0  ;;  %391 = vmatprep.subr.bf16.mxu1 %v533_v0 }
  0x49   :  { %372 = vmatpush3.bf16.msra.mxu0 %v417_v7  ;;  %392 = vmatpush3.bf16.msra.mxu1 %v426_v14 }
  0x4a   :  { %373 = vmatprep.subr.bf16.mxu0 %v533_v0  ;;  %393 = vmatprep.subr.bf16.mxu1 %v533_v0 }
  0x4d   :  { %374 = vmatpush3.bf16.msra.mxu0 %v418_v8  ;;  %394 = vmatpush3.bf16.msra.mxu1 %v427_v15 }
  0x4e   :  { %375 = vmatprep.subr.bf16.mxu0 %v533_v0  ;;  %395 = vmatprep.subr.bf16.mxu1 %v533_v0 }
  0x51   :  { %376 = vmatpush3.bf16.msra.mxu0 %v419_v9  ;;  %396 = vmatpush3.bf16.msra.mxu1 %v428_v16 }
  0x52   :  { %377 = vmatprep.subr.bf16.mxu0 %v533_v0  ;;  %397 = vmatprep.subr.bf16.mxu1 %v533_v0 }
  0x55   :  { %378 = vmatpush3.bf16.msra.mxu0 %v420_v10  ;;  %398 = vmatpush3.bf16.msra.mxu1 %v429_v17 }
  0x58   :  { %380 = vmatmul.mubr.bf16.vlgmr.msra.gmra.mrb[0].mxu0 %v421_v11 }
 0x12b   :  { %v176_v19 = vpop.f32.mrb[0].mxu0 }
 0x12c   :  { %v177_v20 = vadd.f32 %v326_v18, %v176_v19  ;;  %v381_v21 = vpop.f32.mrb[1].mxu0 }
 0x12d   :  { %v179_v22 = vpop.f32.mrb[2].mxu0 }
 0x12e   :  { %v185_v23 = vmul.f32 0.70710677, %v177_v20  ;;  %v180_v24 = vadd.f32 %v326_v18, %v179_v22  ;;  %v382_v25 = vpop.f32.mrb[3].mxu0  ;;  %v183_v30 = vmul.f32 0.5, %v177_v20 }
 0x130   :  { %430 = verf.f32 %v185_v23  ;;  %v186_v26 = vmul.f32 0.70710677, %v180_v24  ;;  %v184_v31 = vmul.f32 0.5, %v180_v24 }
 0x132   :  { %432 = verf.f32 %v186_v26 }
 0x13a   :  { %v431_v27 = vpop.eup %430 }
 0x13b   :  { %v189_v28 = vadd.f32 1.0, %v431_v27 }
 0x13c   :  { %v433_v29 = vpop.eup %432 }
 0x13d   :  { %v190_v32 = vadd.f32 1.0, %v433_v29  ;;  %v191_v33 = vmul.f32 %v189_v28, %v183_v30 }
 0x13f   :  { %v192_v34 = vmul.f32 %v190_v32, %v184_v31 }
 0x141   :  { %v193_v35 = vpack.c.bf16 %v192_v34, %v191_v33 }
 0x143   :  { %400 = vmatmul.mubr.bf16.vlgmr.msra.gmra.mrb[0].mxu1 %v193_v35 }
 0x216   :  { %v299_v37 = vpop.f32.mrb[0].mxu1 }
 0x217   :  { %v300_v38 = vadd.f32 %v336_v36, %v299_v37  ;;  %v401_v39 = vpop.f32.mrb[1].mxu1 }
 0x218   :  { %v302_v40 = vpop.f32.mrb[2].mxu1 }
 0x219   :  { %306 = vst [vmem:[#allocation8] sm:$0xff] %v300_v38  ;;  %v303_v41 = vadd.f32 %v336_v36, %v302_v40  ;;  %v402_v42 = vpop.f32.mrb[3].mxu1 }
 0x21b   :  { %307 = vst [vmem:[#allocation8 + $0x8] sm:$0xff] %v303_v41 }
 0x21c   :  { %511 = shalt.err (!%p508_p0)
}
 0x21d   :  { %s512_s10 = scalar_lea.hbm %s643_s5, 256 }
 0x21e   :  { %p513_p1 = scmp.ne.s32.totalorder %s643_s5, %s512_s10  ;;  %p516_p2 = scmp.lt.u32.totalorder %s512_s10, %s643_s5 }
 0x220   :  { %p518_p3 = pnand %p516_p2, %p513_p1 }
 0x222   :  { %521 = shalt.err (!%p518_p3)
}
 0x223   :  { %s536_s15 = smov 128   ;;  %s537_s16 = smov 8  }
 0x224   :  { %319 = dma.vmem_to_hbm [thread:$0]  %s314_s7, 256, %s643_s5, [#allocation4], %s536_s15, %s536_s15, %s537_s16  }
 0x225   :  { %526 = dma.done.wait [#allocation4], 256  }
 0x226   :  { %527 = vsyncadd [#allocation4], 4294967040 }
 0x227   :  { %323 = vsyncpa [#allocation3], 1 }
 0x228   :  { %324 = vsyncpa [#allocation6], 1 }
 0x229   :  { %325 = vsyncpa [#allocation4], 1 }

</bundles_post_ra>
